<compile_context>
chip_gen: v7x
topology: tpu7x:2x2x1
jax: 0.10.0
libtpu: 0.0.40
codegen_flags: <defaults>
</compile_context>

<pallas_src>
import math

import jax
import jax.numpy as jnp
from jax.experimental import pallas as pl
from jax.experimental.pallas import tpu as pltpu


def make_sinusoidal_pe(embed_dim: int, max_seq_length: int = 32) -> jnp.ndarray:
    """Deterministic construction of the pe buffer, identical to the torch init."""
    assert embed_dim % 2 == 0, "embed_dim must be even (same constraint as the torch code)"
    position = jnp.arange(max_seq_length, dtype=jnp.float32)[:, None]          # (S, 1)
    div_term = jnp.exp(
        jnp.arange(0, embed_dim, 2, dtype=jnp.float32)
        * (-math.log(10000.0) / embed_dim)
    )                                                                           # (D/2,)
    angles = position * div_term                                                # (S, D/2)
    pe = jnp.zeros((max_seq_length, embed_dim), dtype=jnp.float32)
    pe = pe.at[:, 0::2].set(jnp.sin(angles))
    pe = pe.at[:, 1::2].set(jnp.cos(angles))
    return pe[None, :, :]                                                       # (1, S_max, D)


def _add_pe_kernel(x_ref, pe_ref, o_ref):
    # x_ref: (TB, TC) or (TB, TS, D); pe_ref: (1, TC) or (1, TS, D).
    # Leading-dim broadcast is a sublane/row broadcast on the VPU — the kernel
    # is HBM-bound with large VALU slack, so this is free filler.
    o_ref[...] = x_ref[...] + pe_ref[...]


def _sublane(itemsize: int) -> int:
    return {1: 32, 2: 16, 4: 8}.get(itemsize, 8)


def _vmem_budget():
    """Return (physical_vmem_bytes, vmem_limit_bytes), generation-aware."""
    try:
        cap = int(pltpu.get_tpu_info().vmem_capacity_bytes)
    except Exception:                       # query unavailable -> conservative (v7x-sized)
        cap = 64 * 1024 * 1024
    if cap >= 100 * 1024 * 1024:            # v5e / v6e: 128 MiB physical VMEM
        limit = 64 * 1024 * 1024
    else:                                   # v7x: 64 MiB physical per TensorCore
        limit = 32 * 1024 * 1024
    return cap, limit


def _choose_tiles_2d(b: int, n: int, itemsize: int, block_budget_bytes: int):
    """Tiles for the lane-dense flattened (B, N=S*D) view. Requires n % 128 == 0."""
    sub = _sublane(itemsize)
    target_elems = max(block_budget_bytes // itemsize, 128 * sub)

    if n <= target_elems:
        tc = n                                           # full row: always legal
    else:
        tc = max(128, min(n, (target_elems // 128) * 128))

    rows_target = max(1, target_elems // tc)
    if rows_target >= b:
        tb = b                                           # full batch dim: always legal
    else:
        tb = min(b, max(sub, (rows_target // sub) * sub))

    # Megacore (v7x): keep >= 2 grid steps along a parallel axis when splittable.
    if pl.cdiv(n, tc) * pl.cdiv(b, tb) < 2:
        if n >= 256:
            tc = max(128, ((n // 128) // 2) * 128)
        elif b >= 2 * sub:
            tb = max(sub, ((b // sub) // 2) * sub)
    return tb, tc


def _choose_tiles_3d(b: int, s: int, d: int, itemsize: int, block_budget_bytes: int):
    """Tiles for the (B, S, D) view (used when S*D is not a multiple of 128)."""
    sub = _sublane(itemsize)
    target_elems = max(block_budget_bytes // itemsize, sub * d)
    slab = s * d                                         # one batch element's (S, D) slab
    if slab <= target_elems:
        ts = s                                           # full S: always legal
        tb = min(b, max(1, target_elems // slab))
    else:
        tb = 1
        ts = min(s, max(sub, ((target_elems // d) // sub) * sub))

    # Megacore (v7x): keep >= 2 grid steps along a parallel axis when splittable.
    if pl.cdiv(s, ts) * pl.cdiv(b, tb) < 2:
        if b >= 2:
            tb = (b + 1) // 2                            # leading dim: any block size legal
        elif s >= 2 * sub:
            ts = max(sub, ((s // sub) // 2) * sub)
    return tb, ts


def sinusoidal_positional_embedding(x: jnp.ndarray, pe: jnp.ndarray,
                                    *, donate_x: bool = False) -> jnp.ndarray:
    """x: (B, S, D), pe: (1, S_max, D)  ->  x + pe[:, :S], shape (B, S, D)."""
    b, s, d = x.shape
    if s > pe.shape[1]:
        raise ValueError(f"seq_length={s} exceeds max_seq_length={pe.shape[1]}")
    if d != pe.shape[2]:
        raise ValueError(f"embed_dim mismatch: x has {d}, pe has {pe.shape[2]}")

    # Torch promotion semantics: pe stays float32, so bf16 x -> float32 output.
    out_dtype = jnp.result_type(x.dtype, pe.dtype)
    itemsize = jnp.dtype(out_dtype).itemsize

    cap, vmem_limit = _vmem_budget()
    block_budget = max(1 << 20, min(8 << 20, vmem_limit // 6))

    n = s * d
    xw = x.astype(out_dtype)
    pe_s = pe[0, :s, :].astype(out_dtype)

    cost = pl.CostEstimate(flops=b * n, transcendentals=0,
                           bytes_accessed=(2 * b * n + n) * itemsize)
    io_aliases = {0: 0} if (donate_x and x.dtype == out_dtype) else {}
    compiler_params = pltpu.CompilerParams(
        # Both axes write disjoint output blocks -> both parallel (v7x megacore).
        dimension_semantics=("parallel", "parallel"),
        vmem_limit_bytes=vmem_limit,
    )
    deep_vmem = cap >= 100 * 1024 * 1024                 # v5e / v6e headroom

    def x_spec(block_shape, index_map, n_steps):
        # Deeper input buffering only where VMEM is plentiful and the grid is
        # long enough for the extra buffer to hide DMA jitter.
        if deep_vmem and n_steps >= 4:
            return pl.BlockSpec(block_shape, index_map, pipeline_mode=pl.Buffered(3))
        return pl.BlockSpec(block_shape, index_map)

    if n % 128 == 0:
        # Lane-dense 2D view: one flattened row per batch element -> unmasked vst.
        x2 = xw.reshape(b, n)
        pe2 = pe_s.reshape(1, n)
        tb, tc = _choose_tiles_2d(b, n, itemsize, block_budget)
        grid_n, grid_b = pl.cdiv(n, tc), pl.cdiv(b, tb)
        grid = (grid_n, grid_b)          # batch innermost -> pe block index constant
                                         # across inner steps -> Pallas skips pe re-DMA.
        xy_map = lambda j, i: (i, j)
        pe_map = lambda j, i: (0, j)
        if grid_n == 1:
            # pe block never changes: a single VMEM buffer suffices.
            pe_spec = pl.BlockSpec((1, tc), pe_map, pipeline_mode=pl.Buffered(1))
        else:
            pe_spec = pl.BlockSpec((1, tc), pe_map)

        out2 = pl.pallas_call(
            _add_pe_kernel,
            out_shape=jax.ShapeDtypeStruct((b, n), out_dtype),
            grid_spec=pltpu.PrefetchScalarGridSpec(
                num_scalar_prefetch=0,
                grid=grid,
                in_specs=[x_spec((tb, tc), xy_map, grid_n * grid_b), pe_spec],
                out_specs=pl.BlockSpec((tb, tc), xy_map),
            ),
            compiler_params=compiler_params,
            cost_estimate=cost,
            input_output_aliases=io_aliases,
        )(x2, pe2)
        return out2.reshape(b, s, d)

    # 3D-tiled path: bounded blocks over (B, S, D), full D per block (always legal),
    # so large non-128-multiple S*D can never blow the VMEM limit.
    tb, ts = _choose_tiles_3d(b, s, d, itemsize, block_budget)
    grid_s, grid_b = pl.cdiv(s, ts), pl.cdiv(b, tb)
    grid = (grid_s, grid_b)              # batch innermost, same pe-DMA-skip argument.
    xy_map = lambda j, i: (i, j, 0)
    pe_map = lambda j, i: (0, j, 0)
    pe3 = pe_s.reshape(1, s, d)
    if grid_s == 1:
        pe_spec = pl.BlockSpec((1, ts, d), pe_map, pipeline_mode=pl.Buffered(1))
    else:
        pe_spec = pl.BlockSpec((1, ts, d), pe_map)

    out = pl.pallas_call(
        _add_pe_kernel,
        out_shape=jax.ShapeDtypeStruct((b, s, d), out_dtype),
        grid_spec=pltpu.PrefetchScalarGridSpec(
            num_scalar_prefetch=0,
            grid=grid,
            in_specs=[x_spec((tb, ts, d), xy_map, grid_s * grid_b), pe_spec],
            out_specs=pl.BlockSpec((tb, ts, d), xy_map),
        ),
        compiler_params=compiler_params,
        cost_estimate=cost,
        input_output_aliases=io_aliases,
    )(xw, pe3)
    return out


if __name__ == "__main__":
    batch = 2
    seq_length = 8
    embed_dim = 32
    max_seq_length = 32

    key = jax.random.PRNGKey(0)
    x = jax.random.normal(key, (batch, seq_length, embed_dim), dtype=jnp.float32)
    pe = make_sinusoidal_pe(embed_dim, max_seq_length)

    # Lane-dense 2D path (S*D = 256, multiple of 128); megacore split -> grid (2, 1).
    out = jax.block_until_ready(sinusoidal_positional_embedding(x, pe))
    ref = x + pe[:, :seq_length]
    assert out.shape == (batch, seq_length, embed_dim)
    assert jnp.allclose(out, ref, atol=1e-6), "mismatch vs reference (lane-dense path)"

    # 3D fallback path (S*D = 160, not a multiple of 128).
    x_b = jax.random.normal(jax.random.PRNGKey(1), (batch, 5, embed_dim), dtype=jnp.float32)
    out_b = jax.block_until_ready(sinusoidal_positional_embedding(x_b, pe))
    assert jnp.allclose(out_b, x_b + pe[:, :5], atol=1e-6), "mismatch vs reference (3D path)"

    # Non-divisible edge blocks on the lane-dense path: n = 20*32 = 640, split
    # tc = 256 -> grid_n = 3 with a partial final column block (640 % 256 != 0).
    x_c = jax.random.normal(jax.random.PRNGKey(2), (batch, 20, embed_dim), dtype=jnp.float32)
    out_c = jax.block_until_ready(sinusoidal_positional_embedding(x_c, pe))
    assert jnp.allclose(out_c, x_c + pe[:, :20], atol=1e-6), "mismatch (2D edge blocks)"

    # Non-divisible batch edge block on the 3D path: b=3, tb=2 -> partial last block.
    x_d = jax.random.normal(jax.random.PRNGKey(3), (3, 5, embed_dim), dtype=jnp.float32)
    out_d = jax.block_until_ready(sinusoidal_positional_embedding(x_d, pe))
    assert jnp.allclose(out_d, x_d + pe[:, :5], atol=1e-6), "mismatch (3D edge blocks)"

    print("KERNEL_OK")
</pallas_src>

<mosaic_0001>
module attributes {stable_mosaic.version = 11 : i64} {
  func.func @_add_pe_kernel(%arg0: i32, %arg1: i32, %arg2: memref<2x128xf32, #tpu.memory_space<vmem>>, %arg3: memref<1x128xf32, #tpu.memory_space<vmem>>, %arg4: memref<2x128xf32, #tpu.memory_space<vmem>>) attributes {dimension_semantics = [#tpu.dimension_semantics<parallel>, #tpu.dimension_semantics<parallel>], iteration_bounds = array<i64: 2, 1>, scalar_prefetch = 0 : i64, scratch_operands = 0 : i64, tpu.core_type = #tpu.core_type<tc>, window_params = [{transform_indices = @transform_0, window_bounds = array<i64: 2, 128>}, {transform_indices = @transform_1, window_bounds = array<i64: 1, 128>}, {transform_indices = @transform_2, window_bounds = array<i64: 2, 128>}]} {
    %c0 = arith.constant 0 : index
    %c0_0 = arith.constant 0 : index
    %0 = vector.load %arg2[%c0, %c0_0] : memref<2x128xf32, #tpu.memory_space<vmem>>, vector<2x128xf32>
    %c0_1 = arith.constant 0 : index
    %c0_2 = arith.constant 0 : index
    %1 = vector.load %arg3[%c0_1, %c0_2] : memref<1x128xf32, #tpu.memory_space<vmem>>, vector<1x128xf32>
    %2 = vector.broadcast %1 : vector<1x128xf32> to vector<2x128xf32>
    %3 = arith.addf %0, %2 : vector<2x128xf32>
    %c0_3 = arith.constant 0 : index
    %c0_4 = arith.constant 0 : index
    %4 = vector.load %arg4[%c0_3, %c0_4] : memref<2x128xf32, #tpu.memory_space<vmem>>, vector<2x128xf32>
    tpu.vector_store %arg4[%c0_3, %c0_4], %3 {strides = array<i32>} : memref<2x128xf32, #tpu.memory_space<vmem>>, vector<2x128xf32>,
    return
  }
  func.func @transform_0(%arg0: i32, %arg1: i32) -> (i32, i32) {
    %c0_i32 = arith.constant 0 : i32
    return %arg1, %arg0 : i32, i32
  }
  func.func @transform_1(%arg0: i32, %arg1: i32) -> (i32, i32) {
    %c0_i32 = arith.constant 0 : i32
    %c0_i32_0 = arith.constant 0 : i32
    return %c0_i32, %arg0 : i32, i32
  }
  func.func @transform_2(%arg0: i32, %arg1: i32) -> (i32, i32) {
    %c0_i32 = arith.constant 0 : i32
    return %arg1, %arg0 : i32, i32
  }
}

</mosaic_0001>

<bundles_post_ra>
// kernel: tpu_custom_call.1
= control target key start
LH: loop header
LB: loop body
LE: loop exit
PB: predicated region body
PF: predicated region fallthrough
CT: control target
= control target key end

     0   :  { %7 = vsyncpa [#allocation3], 0  ;;  %s692_s0 = inlined_call_operand.hbm [shape: f32[2,256], index: 0, kind: input, shape index: {}]   ;;  %s693_s1 = inlined_call_operand.vmem [shape: f32[1,256], index: 1, kind: input, shape index: {}]   ;;  %s694_s2 = inlined_call_operand.hbm [shape: f32[2,256], index: 2, kind: output, shape index: {}]  }
   0x1   :  { %9 = vsyncpa [#allocation3 + $0x1], 0 }
   0x2   :  { %10 = vsyncpa [#allocation4], 0 }
   0x3   :  { %12 = vsyncpa [#allocation4 + $0x1], 0  ;;  %s515_s9 = smov 0   ;;  %s517_s10 = smov 0  }
   0x4   :  { %s519_s11 = smov 0   ;;  %s521_s12 = smov 0  }
   0x5   :  { %s523_s13 = smov 0   ;;  %s525_s14 = smov 0  }
   0x6 LB: > { %s308_s15 = sadd.s32 4294967295, %s496_s14   ;;  %s309_s16 = sadd.s32 4294967294, %s496_s14   ;;  %s496_s14 = sphi %s525_s14, %s18_s14   ;;  %s492_s13 = sphi %s523_s13, %s710_s13   ;;  %s488_s12 = sphi %s521_s12, %s709_s12   ;;  %s484_s11 = sphi %s519_s11, %s708_s11   ;;  %s480_s10 = sphi %s517_s10, %s707_s10   ;;  %s476_s9 = sphi %s515_s9, %s706_s9  }
   0x7   : > { %s30_s17 = sadd.s32 1, %s492_s13  ;;  %s39_s18 = sadd.s32 1, %s484_s11 }
   0x8   : > { %p32_p0 = scmp.ge.s32.totalorder %s30_s17, 2  ;;  %p46_p1 = scmp.ne.s32.totalorder %s484_s11, %s480_s10 }
   0x9   : > { %p47_p2 = scmp.eq.s32.totalorder %s496_s14, 0  ;;  %p52_p3 = scmp.ne.s32.totalorder %s480_s10, %s476_s9 }
   0xa   : > { %s712_s17 = smov (%p32_p0, %s30_s17), 0  ;;  %p53_p5 = scmp.eq.s32.totalorder %s308_s15, 0 }
   0xb   : > { %p556_p4 = por %p47_p2, %p46_p1  ;;  %s35_s20 = ssub.s32 %s492_s13, %s712_s17 }
   0xc   : > { %p104_p6 = scmp.eq.s32.totalorder %s308_s15, 1  ;;  %p37_p7 = scmp.eq.s32.totalorder %s35_s20, 0 }
   0xd   : > { %p562_p8 = por %p53_p5, %p52_p3  ;;  %p110_p10 = scmp.eq.s32.totalorder %s309_s16, 1 }
   0xe   : > { %p566_p9 = por %p104_p6, %p46_p1  ;;  %p334_p13 = scmp.lt.s32.totalorder %s496_s14, 2 }
   0xf   : > { %s571_s23 = scalar_select %p37_p7, %s484_s11, %s39_s18  }
  0x10   : > { %s698_s22 = scalar_select %p566_p9, 1, 0 }
  0x11   : > { %p573_p11 = por %p110_p10, %p52_p3  ;;  %s130_s25 = sand.u32 1, %s484_s11  }
  0x12   : > { %s312_s26 = sshll.u32 %s130_s25, 1  ;;  %s313_s27 = sshll.u32 %s492_s13, 5 }
  0x13   : > { %s699_s24 = scalar_select %p573_p11, 1, 0 }
  0x14   : > { %s584_s30 = scalar_lea.hbm %s692_s0, %s313_s27  ;;  %s134_s3 = scalar_lea.vmem [#allocation2], %s312_s26 }
  0x15   : > { %s143_s4 = sshll.u32 %s134_s3, 4  ;;  %p590_p0 = pnand %p334_p13, %p556_p4  ;;  %s586_s4 = int_to_ptr.vmem [resolvable:$true] %s143_s4 }
  0x16   : > { %s131_s6 = scalar_lea.sflag [#allocation3], %s130_s25  ;;  %s384_s7 = scalar_lea.hbm %s584_s30, 32 }
  0x17   : > { %p385_p3 = scmp.ne.s32.totalorder %s584_s30, %s384_s7  ;;  %p386_p5 = pneg %p590_p0 }
  0x18   : > { %s389_s16 = scalar_lea.hbm %s692_s0, 64  ;;  %p390_p4 = scmp.lt.u32.totalorder %s584_s30, %s692_s0 }
  0x19   : > { %p387_p6 = pnand %p386_p5, %p385_p3  ;;  %p391_p10 = scmp.lt.u32.totalorder %s389_s16, %s384_s7 }
  0x1a   : > { %p393_p12 = scmp.lt.u32.totalorder %s384_s7, %s584_s30 }
  0x1b   : > { %p388_p7 = pneg %p387_p6  ;;  %p392_p13 = por %p391_p10, %p390_p4 }
  0x1d   : > { %p394_p1 = por %p393_p12, %p392_p13 }
  0x1f   : > { %p395_p2 = pnand %p394_p1, %p388_p7 }
  0x21   : > { %398 = shalt.err (!%p395_p2)
}
  0x22   : > { %s399_s20 = scalar_lea.vmem %s586_s4, 32  ;;  %s498_s25 = smov [#allocation2]  }
  0x23   : > { %p400_p3 = scmp.ne.s32.totalorder %s586_s4, %s399_s20  ;;  %s404_s26 = sshll.u32 %s498_s25, 4  ;;  %s405_s26 = int_to_ptr.vmem [resolvable:$false] %s404_s26 }
  0x24   : > { %s406_s27 = scalar_lea.vmem %s405_s26, 64  ;;  %p407_p9 = scmp.lt.s32.totalorder %s586_s4, %s405_s26 }
  0x25   : > { %p402_p6 = pnand %p400_p3, %p386_p5  ;;  %p408_p4 = scmp.lt.s32.totalorder %s406_s27, %s399_s20 }
  0x27   : > { %p403_p11 = pneg %p402_p6  ;;  %p409_p10 = por %p408_p4, %p407_p9 }
  0x29   : > { %p410_p12 = pnand %p409_p10, %p403_p11 }
  0x2b   : > { %413 = shalt.err (!%p410_p12)
}
  0x2c   : > { %329 = dma.hbm_to_vmem [thread:$0]  (!%p590_p0), %s584_s30, 32, %s586_s4, %s131_s6  }
  0x2d   : > { %p701_p1 = scmp.lt.s32.totalorder %s496_s14, 3  ;;  %p702_p2 = scmp.ge.s32.totalorder %s496_s14, 1 }
  0x2f   : > { %p155_p5 = pnand %p702_p2, %p701_p1 }
  0x30   : > { %s626_s28 = sand.u32 (!%p155_p5), 1, %s480_s10  }
  0x31   : > { %158 = sbr.rel (%p155_p5) target bundleno = 85 (0x55), region = 28  ;;  %s315_s29 = sshll.u32 (!%p155_p5), %s626_s28, 1 }
  0x32   : > { %s161_s3 = scalar_lea.sflag (!%p155_p5), [#allocation3], %s626_s28  ;;  %s164_s7 = scalar_lea.vmem (!%p155_p5), [#allocation2], %s315_s29 }
  0x38   : > { %467 = dma.done.wait (%p562_p8), %s161_s3, 32  }
  0x39   : > { %469 = vsyncadd (%p562_p8), %s161_s3, 4294967264  ;;  %p188_p9 = scmp.lt.s32.totalorder %s488_s12, 1  ;;  %s187_s8 = scalar_lea.vmem [#allocation5], %s315_s29  ;;  %v191_v0 = vld [vmem:[%s164_s7] sm:$0x3] }
  0x3a   : > { %s217_s15 = sshll.u32 %s187_s8, 4  ;;  %s319_s16 = sshll.u32 %s488_s12, 5  ;;  %s640_s15 = int_to_ptr.vmem [resolvable:$true] %s217_s15 }
  0x3b   : > { %s189_s30 = scalar_select %p188_p9, %s488_s12, 1 }
  0x3c   : > { %s645_s19 = scalar_lea.hbm %s694_s2, %s319_s16  ;;  %s202_s20 = scalar_lea.sflag [#allocation4], %s626_s28 }
  0x3d   : > { %s190_s6 = scalar_lea.vmem %s693_s1, %s189_s30  ;;  %s414_s25 = scalar_lea.vmem %s640_s15, 32 }
  0x3e   : > { %v317_v1 = vld [vmem:[%s190_s6] ss:$0 sm:$0xff]  ;;  %p415_p8 = scmp.ne.s32.totalorder %s640_s15, %s414_s25  ;;  %p703_p11 = scmp.ne.s32.totalorder %s698_s22, 0 }
  0x3f   : > { %v199_v2 = vadd.f32 %v317_v1, %v191_v0  ;;  %s499_s12 = smov [#allocation5]  }
  0x40   : > { %p416_p0 = pnand %p415_p8, %p703_p11  ;;  %s418_s26 = sshll.u32 %s499_s12, 4  ;;  %s419_s26 = int_to_ptr.vmem [resolvable:$false] %s418_s26 }
  0x41   : > { %200 = vst [vmem:[%s187_s8] sm:$0x3] %v199_v2  ;;  %s420_s27 = scalar_lea.vmem %s419_s26, 64  ;;  %p421_p13 = scmp.lt.s32.totalorder %s640_s15, %s419_s26 }
  0x42   : > { %p417_p7 = pneg %p416_p0  ;;  %p422_p3 = scmp.lt.s32.totalorder %s420_s27, %s414_s25 }
  0x44   : > { %p423_p6 = por %p422_p3, %p421_p13 }
  0x46   : > { %p424_p4 = pnand %p423_p6, %p417_p7 }
  0x48   : > { %427 = shalt.err (!%p424_p4)
}
  0x49   : > { %s428_s28 = scalar_lea.hbm %s645_s19, 32  ;;  %s432_s7 = scalar_lea.hbm %s694_s2, 64 }
  0x4a   : > { %p429_p10 = scmp.ne.s32.totalorder %s645_s19, %s428_s28  ;;  %p433_p2 = scmp.lt.u32.totalorder %s645_s19, %s694_s2 }
  0x4b   : > { %p434_p5 = scmp.lt.u32.totalorder %s432_s7, %s428_s28  ;;  %p436_p8 = scmp.lt.u32.totalorder %s428_s28, %s645_s19 }
  0x4c   : > { %p430_p12 = pnand %p429_p10, %p703_p11 }
  0x4d   : > { %p435_p9 = por %p434_p5, %p433_p2 }
  0x4e   : > { %p431_p1 = pneg %p430_p12 }
  0x4f   : > { %p437_p0 = por %p436_p8, %p435_p9 }
  0x51   : > { %p438_p7 = pnand %p437_p0, %p431_p1 }
  0x53   : > { %441 = shalt.err (!%p438_p7)
}
  0x54   : > { %324 = dma.vmem_to_hbm [thread:$0]  (%p703_p11), %s640_s15, 32, %s645_s19, %s202_s20  }
  0x55 PF: > { %s229_s5 = sand.u32 1, %s476_s9   ;;  %p704_p13 = scmp.ne.s32.totalorder %s699_s24, 0 }
  0x56   : > { %p705_p3 = scmp.ge.s32.totalorder %s496_s14, 2  ;;  %s230_s6 = scalar_lea.sflag [#allocation4], %s229_s5 }
  0x58   : > { %p331_p6 = pnand %p705_p3, %p704_p13 }
  0x5a   : > { %471 = dma.done.wait (!%p331_p6), %s230_s6, 32  }
  0x5b   : > { %473 = vsyncadd (!%p331_p6), %s230_s6, 4294967264  ;;  %s18_s14 = sadd.s32 1, %s496_s14   ;;  %s706_s9 = smov %s480_s10 }
  0x5c   : > { %p15_p4 = scmp.ge.s32.totalorder %s18_s14, 4   ;;  %s707_s10 = smov %s484_s11 }
  0x5d   : > { %s708_s11 = smov %s571_s23  ;;  %s709_s12 = smov %s492_s13 }
  0x5e   : > { %s710_s13 = smov %s712_s17  ;;  %17 = sbr.rel (!%p15_p4) target bundleno = 6 (0x6), region = 76 }
  0x65   :  { %235 = vsyncpa [#allocation3], 1 }
  0x66   :  { %237 = vsyncpa [#allocation3 + $0x1], 1 }
  0x67   :  { %238 = vsyncpa [#allocation4], 1 }
  0x68   :  { %240 = vsyncpa [#allocation4 + $0x1], 1 }

</bundles_post_ra>
